<compile_context>
chip_gen: v6e
topology: v6e:2x2x1
jax: 0.10.0
libtpu: 0.0.40
codegen_flags: <defaults>
</compile_context>

<pallas_src>
import jax
import jax.numpy as jnp
from jax import lax
from jax.experimental import pallas as pl
from jax.experimental.pallas import tpu as pltpu

# ---- synthetic config (small, consistent with the module's __init__) ----
B, T = 2, 8          # per-sentence batch, sequence length
E = 32               # embed_dim
MH = 32              # mhsize (MLP hidden)
Y = 32               # ysize (semantic / vMF dim)
Z = 32               # zsize (syntactic / Gaussian dim)
V = 128              # vocab_size
EPS = 1e-8           # expe.config.eps
LRATIO = 1.0         # expe.config.lratio

B2 = 2 * B           # both sentences stacked along batch (4)
BP = 8               # batch padded to the sublane count -> full vregs
LANES = 128
PDT = jnp.bfloat16   # param / table compute dtype (f32 accumulation)

# lane offsets inside the fused sent2param output slab (128 lanes)
OFF_M1 = 0           # mean1   : Y lanes
OFF_LV1 = Y          # logvar1 : 1 lane
OFF_M2 = 64          # mean2   : Z lanes
OFF_LV2 = 96         # logvar2 : Z lanes

# row offsets inside the packed weight slab (all rows are 128 lanes wide)
R_W1 = 0                     # (2E , 4MH) fused first layers of the 4 param MLPs
R_W2 = R_W1 + 2 * E          # (4MH, 128) fused second layers (block diagonal)
R_DW1Y = R_W2 + 4 * MH       # (Y  , 128) decoder first layer, semantic half
R_DW1Z = R_DW1Y + Y          # (Z  , 128) decoder first layer, syntax half
R_DW2 = R_DW1Z + Z           # (MH , 128) decoder output layer (V == 128)
W_ROWS = R_DW2 + MH

# lane offsets inside the (small) f32 aux slab
A_MASK = 0                   # word_avg mask            (T lanes)
A_TMASK = A_MASK + T         # target mask              (T lanes)
A_NOISE = A_TMASK + T        # Gaussian noise           (Z lanes)
AUX_W = A_NOISE + Z

assert 4 * MH <= LANES and Y + 1 <= OFF_M2 and OFF_LV2 + Z <= LANES
assert V == LANES and Y + Z + 2 <= LANES and MH <= LANES and 2 * E <= LANES
assert B2 <= BP


def _softplus(x):
    # numerically stable softplus
    return jnp.maximum(x, 0.0) + jnp.log(1.0 + jnp.exp(-jnp.abs(x)))


def vgvae_kernel(ids_ref, aux_ref, tab_ref, w_ref, b_ref, out_ref):
    """Fused embed-gather + word_avg encode + sent2param + sample + decode + KL."""
    f32 = jnp.float32
    cdt = tab_ref.dtype                                  # bf16 MXU operand dtype

    ids = ids_ref[...]                                   # (BP, 2T) int32 [sent | tgt]
    sent = ids[:, 0:T]                                   # (BP, T)
    tgt = ids[:, T:2 * T]                                # (BP, T)

    aux = aux_ref[...]                                   # (BP, AUX_W) f32
    mask = aux[:, A_MASK:A_MASK + T]                     # (BP, T)
    tmask = aux[:, A_TMASK:A_TMASK + T]                  # (BP, T)
    noise = aux[:, A_NOISE:A_NOISE + Z]                  # (BP, Z)

    # --- in-kernel embedding gather + word_avg encoders (y & z streams) ---
    # masked token counts (BP, V); counts @ [emb_y | emb_z] == sum_t mask*emb[sent]
    iota_v = lax.broadcasted_iota(jnp.int32, (BP, T, V), 2)
    sent_oh = (iota_v == sent[:, :, None]).astype(f32)                 # (BP, T, V)
    counts = jnp.sum(sent_oh * mask[:, :, None], axis=1)               # (BP, V)
    vec_sum = jnp.dot(counts.astype(cdt), tab_ref[...],
                      preferred_element_type=f32)                      # (BP, 2E)
    inv_len = pl.reciprocal(
        jnp.sum(mask, axis=-1, keepdims=True) + EPS, approx=True)      # (BP, 1)
    vecs = vec_sum * inv_len                                           # [yvec | zvec]

    # --- sent2param: 4 MLPs fused into 2 matmuls (block-diag packed weights) ---
    w1 = w_ref[R_W1:R_W1 + 2 * E, :]                     # (2E, 4MH)
    w2 = w_ref[R_W2:R_W2 + 4 * MH, :]                    # (4MH, 128)
    b1 = b_ref[0:1, :]
    b2 = b_ref[1:2, :]
    h1 = jnp.maximum(
        jnp.dot(vecs.astype(cdt), w1, preferred_element_type=f32) + b1, 0.0)
    pout = jnp.dot(h1.astype(cdt), w2, preferred_element_type=f32) + b2  # (BP, 128)

    mean1 = pout[:, OFF_M1:OFF_M1 + Y]                   # (BP, Y)
    logvar1 = pout[:, OFF_LV1:OFF_LV1 + 1]               # (BP, 1)
    mean2 = pout[:, OFF_M2:OFF_M2 + Z]                   # (BP, Z)
    logvar2 = pout[:, OFF_LV2:OFF_LV2 + Z]               # (BP, Z)

    var = _softplus(logvar1) + 1.0                       # vMF kappa
    semantic = mean1 * lax.rsqrt(
        jnp.sum(mean1 * mean1, axis=-1, keepdims=True) + EPS)          # L2-normalize
    # TODO(synk): VonMisesFisher(mean, var).rsample() (rejection sampling + Bessel
    # functions) has no clean Pallas equivalent; use the vMF mode, keep kappa in graph.
    semantic = semantic + 0.0 * var

    syntax = mean2 + jnp.exp(0.5 * logvar2) * noise      # Gaussian reparameterization

    # --- bag_of_words decoder: ONE fused first-layer matmul on cat(sem, syn) ---
    cat = jnp.concatenate([semantic, syntax], axis=-1)   # (BP, Y+Z)
    dw1 = w_ref[R_DW1Y:R_DW1Y + Y + Z, :]                # (Y+Z, 128) cols >= MH are 0
    dw2 = w_ref[R_DW2:R_DW2 + MH, :]                     # (MH, V)
    db1 = b_ref[2:3, :]
    db2 = b_ref[3:4, :]
    h = jnp.maximum(
        jnp.dot(cat.astype(cdt), dw1, preferred_element_type=f32) + db1, 0.0)
    logits = jnp.dot(h[:, 0:MH].astype(cdt), dw2,
                     preferred_element_type=f32) + db2                 # (BP, V)

    # log-softmax + target gather (VPU multiply + lane reduce) + masked mean NLL
    mmax = jnp.max(logits, axis=-1, keepdims=True)
    lse = mmax + jnp.log(jnp.sum(jnp.exp(logits - mmax), axis=-1, keepdims=True))
    tgt_oh = (iota_v == tgt[:, :, None]).astype(f32)                   # (BP, T, V)
    picked = jnp.sum(tgt_oh * logits[:, None, :], axis=-1)             # (BP, T)
    logp = picked - lse                                                # log-softmax @ tgt
    inv_tok = pl.reciprocal(
        jnp.sum(tmask, axis=-1, keepdims=True) + EPS, approx=True)
    nll = -jnp.sum(logp * tmask, axis=-1, keepdims=True) * inv_tok     # (BP, 1)

    # gauss_kl_div(mean2, logvar2): KL(N(mean2, exp(logvar2)) || N(0, I))
    kl = -0.5 * jnp.sum(1.0 + logvar2 - mean2 * mean2 - jnp.exp(logvar2),
                        axis=-1, keepdims=True)                        # (BP, 1)

    # lane-dense output slab: one unmasked full-vreg 128-lane store
    pad = jnp.zeros((BP, LANES - (Y + Z + 2)), f32)
    out_ref[...] = jnp.concatenate([cat, nll, kl, pad], axis=-1)


def pack_params(params):
    """Pack the 21 small parameter tensors into two contiguous slabs (bf16 w, f32 b)."""
    (m1w1, m1b1, m1w2, m1b2,
     lv1w1, lv1b1, lv1w2, lv1b2,
     m2w1, m2b1, m2w2, m2b2,
     lv2w1, lv2b1, lv2w2, lv2b2,
     dw1y, dw1z, db1, dw2, db2) = params
    f32 = jnp.float32

    w = jnp.zeros((W_ROWS, LANES), f32)
    # fused first layers: rows 0:E take yvecs, rows E:2E take zvecs
    w = w.at[R_W1 + 0:R_W1 + E, 0 * MH:1 * MH].set(m1w1)
    w = w.at[R_W1 + 0:R_W1 + E, 1 * MH:2 * MH].set(lv1w1)
    w = w.at[R_W1 + E:R_W1 + 2 * E, 2 * MH:3 * MH].set(m2w1)
    w = w.at[R_W1 + E:R_W1 + 2 * E, 3 * MH:4 * MH].set(lv2w1)
    # fused second layers, block diagonal into the 128-lane param slab
    w = w.at[R_W2 + 0 * MH:R_W2 + 1 * MH, OFF_M1:OFF_M1 + Y].set(m1w2)
    w = w.at[R_W2 + 1 * MH:R_W2 + 2 * MH, OFF_LV1:OFF_LV1 + 1].set(lv1w2)
    w = w.at[R_W2 + 2 * MH:R_W2 + 3 * MH, OFF_M2:OFF_M2 + Z].set(m2w2)
    w = w.at[R_W2 + 3 * MH:R_W2 + 4 * MH, OFF_LV2:OFF_LV2 + Z].set(lv2w2)
    # decoder weights (columns beyond MH / V are zero padding)
    w = w.at[R_DW1Y:R_DW1Y + Y, 0:MH].set(dw1y)
    w = w.at[R_DW1Z:R_DW1Z + Z, 0:MH].set(dw1z)
    w = w.at[R_DW2:R_DW2 + MH, 0:V].set(dw2)

    b = jnp.zeros((8, LANES), f32)
    b = b.at[0, 0 * MH:1 * MH].set(m1b1[0])
    b = b.at[0, 1 * MH:2 * MH].set(lv1b1[0])
    b = b.at[0, 2 * MH:3 * MH].set(m2b1[0])
    b = b.at[0, 3 * MH:4 * MH].set(lv2b1[0])
    b = b.at[1, OFF_M1:OFF_M1 + Y].set(m1b2[0])
    b = b.at[1, OFF_LV1:OFF_LV1 + 1].set(lv1b2[0])
    b = b.at[1, OFF_M2:OFF_M2 + Z].set(m2b2[0])
    b = b.at[1, OFF_LV2:OFF_LV2 + Z].set(lv2b2[0])
    b = b.at[2, 0:MH].set(db1[0])
    b = b.at[3, 0:V].set(db2[0])
    return w.astype(PDT), b


def pack_embed(emb_y_tab, emb_z_tab):
    """Pack the two (V, E) embedding tables into one (V, 2E) bf16 slab."""
    return jnp.concatenate([emb_y_tab, emb_z_tab], axis=-1).astype(PDT)


# advisory cost estimate (tiny kernel; helps XLA schedule the custom call)
_FLOPS = (2 * BP * (V * 2 * E + 2 * E * LANES + 4 * MH * LANES
                    + (Y + Z) * LANES + MH * V) + 8 * BP * T * V)
_TRANS = BP * (V + 4 * Z + 8)
_BYTES = (BP * 2 * T * 4 + BP * AUX_W * 4 + V * 2 * E * 2
          + W_ROWS * LANES * 2 + 8 * LANES * 4 + BP * LANES * 4)


def vgvae_forward(w_packed, b_packed, emb_table,
                  sent1, mask1, sent2, mask2,
                  tgt1, tgt_mask1, tgt2, tgt_mask2,
                  noise1, noise2, vtemp, gtemp):
    """Both sentences go through ONE fused pallas_call (stacked & sublane-padded)."""
    f32 = jnp.float32
    sent = jnp.concatenate([sent1, sent2], axis=0).astype(jnp.int32)   # (B2, T)
    tgt = jnp.concatenate([tgt1, tgt2], axis=0).astype(jnp.int32)      # (B2, T)
    mask = jnp.concatenate([mask1, mask2], axis=0).astype(f32)
    tmask = jnp.concatenate([tgt_mask1, tgt_mask2], axis=0).astype(f32)
    noise = jnp.concatenate([noise1, noise2], axis=0).astype(f32)

    # int32 id slab and f32 aux slab, batch-padded to 8 sublanes
    ids = jnp.pad(jnp.concatenate([sent, tgt], axis=-1),
                  ((0, BP - B2), (0, 0)))                              # (BP, 2T)
    aux = jnp.pad(jnp.concatenate([mask, tmask, noise], axis=-1),
                  ((0, BP - B2), (0, 0)))                              # (BP, AUX_W)

    vmem = pl.BlockSpec(memory_space=pltpu.MemorySpace.VMEM)
    out = pl.pallas_call(
        vgvae_kernel,
        out_shape=jax.ShapeDtypeStruct((BP, LANES), f32),
        in_specs=[vmem, vmem, vmem, vmem, vmem],
        out_specs=vmem,
        cost_estimate=pl.CostEstimate(flops=_FLOPS, transcendentals=_TRANS,
                                      bytes_accessed=_BYTES),
    )(ids, aux, emb_table, w_packed, b_packed)

    sem = out[:B2, 0:Y]
    syn = out[:B2, Y:Y + Z]
    ll = out[:B2, Y + Z]
    kl = out[:B2, Y + Z + 1]
    sem1, sem2 = sem[:B], sem[B:]
    syn1, syn2 = syn[:B], syn[B:]
    ll1, ll2 = ll[:B], ll[B:]
    kl1, kl2 = kl[:B], kl[B:]

    # TODO(synk): vMF KL divergence needs modified Bessel functions (no Pallas
    # equivalent); contributes 0 here.
    vkl = jnp.zeros_like(kl1)
    gkl = kl1 + kl2
    rec_logloss = ll1 + ll2
    loss = LRATIO * rec_logloss + vtemp * vkl + gtemp * gkl            # per-sample (B,)

    vkl_mean = vkl.mean()
    gkl_mean = kl1.mean() + kl2.mean()
    rec_logloss_mean = ll1.mean() + ll2.mean()
    loss_mean = LRATIO * rec_logloss_mean + vtemp * vkl_mean + gtemp * gkl_mean
    return (loss, loss_mean, vkl_mean, gkl_mean, rec_logloss_mean,
            sem1, syn1, sem2, syn2)


vgvae_forward = jax.jit(vgvae_forward)


def _init_mlp(key, d_in, d_h, d_out):
    k1, k2 = jax.random.split(key)
    w1 = jax.random.normal(k1, (d_in, d_h), jnp.float32) / jnp.sqrt(float(d_in))
    b1 = jnp.zeros((1, d_h), jnp.float32)
    w2 = jax.random.normal(k2, (d_h, d_out), jnp.float32) / jnp.sqrt(float(d_h))
    b2 = jnp.zeros((1, d_out), jnp.float32)
    return [w1, b1, w2, b2]


if __name__ == "__main__":
    key = jax.random.PRNGKey(0)
    ks = jax.random.split(key, 12)

    # deterministic synthetic parameters (shapes follow the module's __init__)
    emb_y_tab = jax.random.normal(ks[0], (V, E), jnp.float32) * 0.1   # yencode embeddings
    emb_z_tab = jax.random.normal(ks[1], (V, E), jnp.float32) * 0.1   # zencode embeddings
    params = []
    params += _init_mlp(ks[2], E, MH, Y)    # mean1
    params += _init_mlp(ks[3], E, MH, 1)    # logvar1
    params += _init_mlp(ks[4], E, MH, Z)    # mean2
    params += _init_mlp(ks[5], E, MH, Z)    # logvar2
    dk1, dk2, dk3 = jax.random.split(ks[6], 3)
    dw1y = jax.random.normal(dk1, (Y, MH), jnp.float32) / jnp.sqrt(float(Y + Z))
    dw1z = jax.random.normal(dk2, (Z, MH), jnp.float32) / jnp.sqrt(float(Y + Z))
    db1 = jnp.zeros((1, MH), jnp.float32)
    dw2 = jax.random.normal(dk3, (MH, V), jnp.float32) / jnp.sqrt(float(MH))
    db2 = jnp.zeros((1, V), jnp.float32)
    params += [dw1y, dw1z, db1, dw2, db2]

    w_packed, b_packed = pack_params(params)
    emb_table = pack_embed(emb_y_tab, emb_z_tab)

    # deterministic example inputs
    sent1 = jax.random.randint(ks[7], (B, T), 0, V, dtype=jnp.int32)
    sent2 = jax.random.randint(ks[8], (B, T), 0, V, dtype=jnp.int32)
    lengths = jnp.array([T, T - 3], jnp.int32)
    mask1 = (jnp.arange(T)[None, :] < lengths[:, None]).astype(jnp.float32)
    mask2 = (jnp.arange(T)[None, :] < lengths[::-1, None]).astype(jnp.float32)
    tgt1, tgt_mask1 = sent1, mask1
    tgt2, tgt_mask2 = sent2, mask2
    noise1 = jax.random.normal(ks[9], (B, Z), jnp.float32)
    noise2 = jax.random.normal(ks[10], (B, Z), jnp.float32)

    out = vgvae_forward(w_packed, b_packed, emb_table,
                        sent1, mask1, sent2, mask2,
                        tgt1, tgt_mask1, tgt2, tgt_mask2,
                        noise1, noise2, 1e-2, 1e-2)
    jax.block_until_ready(out)
    print("KERNEL_OK")
</pallas_src>

<mosaic_0001>
module attributes {stable_mosaic.version = 11 : i64} {
  func.func @vgvae_kernel(%arg0: memref<8x16xi32, #tpu.memory_space<vmem>>, %arg1: memref<8x48xf32, #tpu.memory_space<vmem>>, %arg2: memref<128x64xbf16, #tpu.memory_space<vmem>>, %arg3: memref<288x128xbf16, #tpu.memory_space<vmem>>, %arg4: memref<8x128xf32, #tpu.memory_space<vmem>>, %arg5: memref<8x128xf32, #tpu.memory_space<vmem>>) attributes {dimension_semantics = [], scalar_prefetch = 0 : i64, scratch_operands = 0 : i64, tpu.core_type = #tpu.core_type<tc>} {
    %c0 = arith.constant 0 : index
    %c0_0 = arith.constant 0 : index
    %0 = vector.load %arg0[%c0, %c0_0] : memref<8x16xi32, #tpu.memory_space<vmem>>, vector<8x16xi32>
    %1 = vector.extract_strided_slice %0 {offsets = [0, 0], sizes = [8, 8], strides = [1, 1]} : vector<8x16xi32> to vector<8x8xi32>
    %2 = vector.extract_strided_slice %0 {offsets = [0, 8], sizes = [8, 8], strides = [1, 1]} : vector<8x16xi32> to vector<8x8xi32>
    %c0_1 = arith.constant 0 : index
    %c0_2 = arith.constant 0 : index
    %3 = vector.load %arg1[%c0_1, %c0_2] : memref<8x48xf32, #tpu.memory_space<vmem>>, vector<8x48xf32>
    %4 = vector.extract_strided_slice %3 {offsets = [0, 0], sizes = [8, 8], strides = [1, 1]} : vector<8x48xf32> to vector<8x8xf32>
    %5 = vector.extract_strided_slice %3 {offsets = [0, 8], sizes = [8, 8], strides = [1, 1]} : vector<8x48xf32> to vector<8x8xf32>
    %6 = vector.extract_strided_slice %3 {offsets = [0, 16], sizes = [8, 32], strides = [1, 1]} : vector<8x48xf32> to vector<8x32xf32>
    %7 = tpu.iota {dimensions = array<i32: 2>} : vector<8x8x128xi32>
    %8 = vector.shape_cast %1 : vector<8x8xi32> to vector<8x8x1xi32>
    %9 = vector.broadcast %8 : vector<8x8x1xi32> to vector<8x8x128xi32>
    %10 = arith.cmpi eq, %7, %9 : vector<8x8x128xi32>
    %11 = arith.extui %10 : vector<8x8x128xi1> to vector<8x8x128xi32>
    %12 = arith.sitofp %11 : vector<8x8x128xi32> to vector<8x8x128xf32>
    %13 = vector.shape_cast %4 : vector<8x8xf32> to vector<8x8x1xf32>
    %14 = vector.broadcast %13 : vector<8x8x1xf32> to vector<8x8x128xf32>
    %15 = arith.mulf %12, %14 : vector<8x8x128xf32>
    %cst = arith.constant dense<0.000000e+00> : vector<8x128xf32>
    %16 = vector.multi_reduction <add>, %15, %cst [1] : vector<8x8x128xf32> to vector<8x128xf32>
    %17 = arith.truncf %16 : vector<8x128xf32> to vector<8x128xbf16>
    %c0_3 = arith.constant 0 : index
    %c0_4 = arith.constant 0 : index
    %18 = vector.load %arg2[%c0_3, %c0_4] : memref<128x64xbf16, #tpu.memory_space<vmem>>, vector<128x64xbf16>
    %cst_5 = arith.constant dense<0.000000e+00> : vector<8x64xf32>
    %19 = tpu.matmul %17, %18, %cst_5 {dimension_numbers = #tpu.dot_dimension_numbers<[1], [0], [0], [1], [0, 0, 1, 1], [], []>} : vector<8x128xbf16>, vector<128x64xbf16>, vector<8x64xf32> -> vector<8x64xf32>
    %cst_6 = arith.constant dense<0.000000e+00> : vector<8xf32>
    %20 = vector.multi_reduction <add>, %4, %cst_6 [1] : vector<8x8xf32> to vector<8xf32>
    %21 = vector.shape_cast %20 : vector<8xf32> to vector<8x1xf32>
    %cst_7 = arith.constant 9.99999993E-9 : f32
    %22 = vector.broadcast %cst_7 : f32 to vector<8x1xf32>
    %23 = arith.addf %21, %22 : vector<8x1xf32>
    %24 = tpu.reciprocal %23 {approx = true} : vector<8x1xf32> -> vector<8x1xf32>
    %25 = vector.broadcast %24 : vector<8x1xf32> to vector<8x64xf32>
    %26 = arith.mulf %19, %25 : vector<8x64xf32>
    %c0_8 = arith.constant 0 : index
    %c0_9 = arith.constant 0 : index
    %27 = vector.load %arg3[%c0_8, %c0_9] : memref<288x128xbf16, #tpu.memory_space<vmem>>, vector<64x128xbf16>
    %c64 = arith.constant 64 : index
    %c0_10 = arith.constant 0 : index
    %28 = vector.load %arg3[%c64, %c0_10] : memref<288x128xbf16, #tpu.memory_space<vmem>>, vector<128x128xbf16>
    %c0_11 = arith.constant 0 : index
    %c0_12 = arith.constant 0 : index
    %29 = vector.load %arg4[%c0_11, %c0_12] : memref<8x128xf32, #tpu.memory_space<vmem>>, vector<1x128xf32>
    %c1 = arith.constant 1 : index
    %c0_13 = arith.constant 0 : index
    %30 = vector.load %arg4[%c1, %c0_13] : memref<8x128xf32, #tpu.memory_space<vmem>>, vector<1x128xf32>
    %31 = arith.truncf %26 : vector<8x64xf32> to vector<8x64xbf16>
    %cst_14 = arith.constant dense<0.000000e+00> : vector<8x128xf32>
    %32 = tpu.matmul %31, %27, %cst_14 {dimension_numbers = #tpu.dot_dimension_numbers<[1], [0], [0], [1], [0, 0, 1, 1], [], []>} : vector<8x64xbf16>, vector<64x128xbf16>, vector<8x128xf32> -> vector<8x128xf32>
    %33 = vector.broadcast %29 : vector<1x128xf32> to vector<8x128xf32>
    %34 = arith.addf %32, %33 : vector<8x128xf32>
    %cst_15 = arith.constant 0.000000e+00 : f32
    %35 = vector.broadcast %cst_15 : f32 to vector<8x128xf32>
    %36 = arith.maximumf %34, %35 : vector<8x128xf32>
    %37 = arith.truncf %36 : vector<8x128xf32> to vector<8x128xbf16>
    %cst_16 = arith.constant dense<0.000000e+00> : vector<8x128xf32>
    %38 = tpu.matmul %37, %28, %cst_16 {dimension_numbers = #tpu.dot_dimension_numbers<[1], [0], [0], [1], [0, 0, 1, 1], [], []>} : vector<8x128xbf16>, vector<128x128xbf16>, vector<8x128xf32> -> vector<8x128xf32>
    %39 = vector.broadcast %30 : vector<1x128xf32> to vector<8x128xf32>
    %40 = arith.addf %38, %39 : vector<8x128xf32>
    %41 = vector.extract_strided_slice %40 {offsets = [0, 0], sizes = [8, 32], strides = [1, 1]} : vector<8x128xf32> to vector<8x32xf32>
    %42 = vector.extract_strided_slice %40 {offsets = [0, 32], sizes = [8, 1], strides = [1, 1]} : vector<8x128xf32> to vector<8x1xf32>
    %43 = vector.extract_strided_slice %40 {offsets = [0, 64], sizes = [8, 32], strides = [1, 1]} : vector<8x128xf32> to vector<8x32xf32>
    %44 = vector.extract_strided_slice %40 {offsets = [0, 96], sizes = [8, 32], strides = [1, 1]} : vector<8x128xf32> to vector<8x32xf32>
    %cst_17 = arith.constant 0.000000e+00 : f32
    %45 = vector.broadcast %cst_17 : f32 to vector<8x1xf32>
    %46 = arith.maximumf %42, %45 : vector<8x1xf32>
    %47 = math.absf %42 : vector<8x1xf32>
    %cst_18 = arith.constant 0.000000e+00 : f32
    %48 = vector.broadcast %cst_18 : f32 to vector<8x1xf32>
    %49 = arith.subf %48, %47 : vector<8x1xf32>
    %50 = math.exp %49 : vector<8x1xf32>
    %cst_19 = arith.constant 1.000000e+00 : f32
    %51 = vector.broadcast %cst_19 : f32 to vector<8x1xf32>
    %52 = arith.addf %51, %50 : vector<8x1xf32>
    %53 = math.log %52 : vector<8x1xf32>
    %54 = arith.addf %46, %53 : vector<8x1xf32>
    %cst_20 = arith.constant 1.000000e+00 : f32
    %55 = vector.broadcast %cst_20 : f32 to vector<8x1xf32>
    %56 = arith.addf %54, %55 : vector<8x1xf32>
    %57 = arith.mulf %41, %41 : vector<8x32xf32>
    %cst_21 = arith.constant dense<0.000000e+00> : vector<8xf32>
    %58 = vector.multi_reduction <add>, %57, %cst_21 [1] : vector<8x32xf32> to vector<8xf32>
    %59 = vector.shape_cast %58 : vector<8xf32> to vector<8x1xf32>
    %cst_22 = arith.constant 9.99999993E-9 : f32
    %60 = vector.broadcast %cst_22 : f32 to vector<8x1xf32>
    %61 = arith.addf %59, %60 : vector<8x1xf32>
    %62 = math.rsqrt %61 : vector<8x1xf32>
    %63 = vector.broadcast %62 : vector<8x1xf32> to vector<8x32xf32>
    %64 = arith.mulf %41, %63 : vector<8x32xf32>
    %cst_23 = arith.constant 0.000000e+00 : f32
    %65 = vector.broadcast %cst_23 : f32 to vector<8x1xf32>
    %66 = arith.mulf %65, %56 : vector<8x1xf32>
    %67 = vector.broadcast %66 : vector<8x1xf32> to vector<8x32xf32>
    %68 = arith.addf %64, %67 : vector<8x32xf32>
    %cst_24 = arith.constant 5.000000e-01 : f32
    %69 = vector.broadcast %cst_24 : f32 to vector<8x32xf32>
    %70 = arith.mulf %69, %44 : vector<8x32xf32>
    %71 = math.exp %70 : vector<8x32xf32>
    %72 = arith.mulf %71, %6 : vector<8x32xf32>
    %73 = arith.addf %43, %72 : vector<8x32xf32>
    %74 = tpu.concatenate %68, %73 in 1 : vector<8x32xf32>, vector<8x32xf32> -> vector<8x64xf32>
    %c192 = arith.constant 192 : index
    %c0_25 = arith.constant 0 : index
    %75 = vector.load %arg3[%c192, %c0_25] : memref<288x128xbf16, #tpu.memory_space<vmem>>, vector<64x128xbf16>
    %c256 = arith.constant 256 : index
    %c0_26 = arith.constant 0 : index
    %76 = vector.load %arg3[%c256, %c0_26] : memref<288x128xbf16, #tpu.memory_space<vmem>>, vector<32x128xbf16>
    %c2 = arith.constant 2 : index
    %c0_27 = arith.constant 0 : index
    %77 = vector.load %arg4[%c2, %c0_27] : memref<8x128xf32, #tpu.memory_space<vmem>>, vector<1x128xf32>
    %c3 = arith.constant 3 : index
    %c0_28 = arith.constant 0 : index
    %78 = vector.load %arg4[%c3, %c0_28] : memref<8x128xf32, #tpu.memory_space<vmem>>, vector<1x128xf32>
    %79 = arith.truncf %74 : vector<8x64xf32> to vector<8x64xbf16>
    %cst_29 = arith.constant dense<0.000000e+00> : vector<8x128xf32>
    %80 = tpu.matmul %79, %75, %cst_29 {dimension_numbers = #tpu.dot_dimension_numbers<[1], [0], [0], [1], [0, 0, 1, 1], [], []>} : vector<8x64xbf16>, vector<64x128xbf16>, vector<8x128xf32> -> vector<8x128xf32>
    %81 = vector.broadcast %77 : vector<1x128xf32> to vector<8x128xf32>
    %82 = arith.addf %80, %81 : vector<8x128xf32>
    %cst_30 = arith.constant 0.000000e+00 : f32
    %83 = vector.broadcast %cst_30 : f32 to vector<8x128xf32>
    %84 = arith.maximumf %82, %83 : vector<8x128xf32>
    %85 = vector.extract_strided_slice %84 {offsets = [0, 0], sizes = [8, 32], strides = [1, 1]} : vector<8x128xf32> to vector<8x32xf32>
    %86 = arith.truncf %85 : vector<8x32xf32> to vector<8x32xbf16>
    %cst_31 = arith.constant dense<0.000000e+00> : vector<8x128xf32>
    %87 = tpu.matmul %86, %76, %cst_31 {dimension_numbers = #tpu.dot_dimension_numbers<[1], [0], [0], [1], [0, 0, 1, 1], [], []>} : vector<8x32xbf16>, vector<32x128xbf16>, vector<8x128xf32> -> vector<8x128xf32>
    %88 = vector.broadcast %78 : vector<1x128xf32> to vector<8x128xf32>
    %89 = arith.addf %87, %88 : vector<8x128xf32>
    %cst_32 = arith.constant dense<0xFF800000> : vector<8xf32>
    %90 = vector.multi_reduction <maximumf>, %89, %cst_32 [1] : vector<8x128xf32> to vector<8xf32>
    %91 = vector.shape_cast %90 : vector<8xf32> to vector<8x1xf32>
    %92 = vector.broadcast %91 : vector<8x1xf32> to vector<8x128xf32>
    %93 = arith.subf %89, %92 : vector<8x128xf32>
    %94 = math.exp %93 : vector<8x128xf32>
    %cst_33 = arith.constant dense<0.000000e+00> : vector<8xf32>
    %95 = vector.multi_reduction <add>, %94, %cst_33 [1] : vector<8x128xf32> to vector<8xf32>
    %96 = vector.shape_cast %95 : vector<8xf32> to vector<8x1xf32>
    %97 = math.log %96 : vector<8x1xf32>
    %98 = arith.addf %91, %97 : vector<8x1xf32>
    %99 = vector.shape_cast %2 : vector<8x8xi32> to vector<8x8x1xi32>
    %100 = vector.broadcast %99 : vector<8x8x1xi32> to vector<8x8x128xi32>
    %101 = arith.cmpi eq, %7, %100 : vector<8x8x128xi32>
    %102 = arith.extui %101 : vector<8x8x128xi1> to vector<8x8x128xi32>
    %103 = arith.sitofp %102 : vector<8x8x128xi32> to vector<8x8x128xf32>
    %104 = vector.shape_cast %89 : vector<8x128xf32> to vector<8x1x128xf32>
    %105 = vector.broadcast %104 : vector<8x1x128xf32> to vector<8x8x128xf32>
    %106 = arith.mulf %103, %105 : vector<8x8x128xf32>
    %cst_34 = arith.constant dense<0.000000e+00> : vector<8x8xf32>
    %107 = vector.multi_reduction <add>, %106, %cst_34 [2] : vector<8x8x128xf32> to vector<8x8xf32>
    %108 = vector.broadcast %98 : vector<8x1xf32> to vector<8x8xf32>
    %109 = arith.subf %107, %108 : vector<8x8xf32>
    %cst_35 = arith.constant dense<0.000000e+00> : vector<8xf32>
    %110 = vector.multi_reduction <add>, %5, %cst_35 [1] : vector<8x8xf32> to vector<8xf32>
    %111 = vector.shape_cast %110 : vector<8xf32> to vector<8x1xf32>
    %cst_36 = arith.constant 9.99999993E-9 : f32
    %112 = vector.broadcast %cst_36 : f32 to vector<8x1xf32>
    %113 = arith.addf %111, %112 : vector<8x1xf32>
    %114 = tpu.reciprocal %113 {approx = true} : vector<8x1xf32> -> vector<8x1xf32>
    %115 = arith.mulf %109, %5 : vector<8x8xf32>
    %cst_37 = arith.constant dense<0.000000e+00> : vector<8xf32>
    %116 = vector.multi_reduction <add>, %115, %cst_37 [1] : vector<8x8xf32> to vector<8xf32>
    %117 = vector.shape_cast %116 : vector<8xf32> to vector<8x1xf32>
    %cst_38 = arith.constant 0.000000e+00 : f32
    %118 = vector.broadcast %cst_38 : f32 to vector<8x1xf32>
    %119 = arith.subf %118, %117 : vector<8x1xf32>
    %120 = arith.mulf %119, %114 : vector<8x1xf32>
    %cst_39 = arith.constant 1.000000e+00 : f32
    %121 = vector.broadcast %cst_39 : f32 to vector<8x32xf32>
    %122 = arith.addf %121, %44 : vector<8x32xf32>
    %123 = arith.mulf %43, %43 : vector<8x32xf32>
    %124 = arith.subf %122, %123 : vector<8x32xf32>
    %125 = math.exp %44 : vector<8x32xf32>
    %126 = arith.subf %124, %125 : vector<8x32xf32>
    %cst_40 = arith.constant dense<0.000000e+00> : vector<8xf32>
    %127 = vector.multi_reduction <add>, %126, %cst_40 [1] : vector<8x32xf32> to vector<8xf32>
    %128 = vector.shape_cast %127 : vector<8xf32> to vector<8x1xf32>
    %cst_41 = arith.constant -5.000000e-01 : f32
    %129 = vector.broadcast %cst_41 : f32 to vector<8x1xf32>
    %130 = arith.mulf %129, %128 : vector<8x1xf32>
    %cst_42 = arith.constant 0.000000e+00 : f32
    %131 = vector.broadcast %cst_42 : f32 to vector<8x62xf32>
    %132 = tpu.concatenate %74, %120, %130, %131 in 1 : vector<8x64xf32>, vector<8x1xf32>, vector<8x1xf32>, vector<8x62xf32> -> vector<8x128xf32>
    %c0_43 = arith.constant 0 : index
    %c0_44 = arith.constant 0 : index
    %133 = vector.load %arg5[%c0_43, %c0_44] : memref<8x128xf32, #tpu.memory_space<vmem>>, vector<8x128xf32>
    tpu.vector_store %arg5[%c0_43, %c0_44], %132 {strides = array<i32>} : memref<8x128xf32, #tpu.memory_space<vmem>>, vector<8x128xf32>,
    return
  }
}

</mosaic_0001>

<bundles_post_ra>
// kernel: vgvae_forward.1
= control target key start
LH: loop header
LB: loop body
LE: loop exit
PB: predicated region body
PF: predicated region fallthrough
CT: control target
= control target key end

     0   :  { %10 = vsyncpa [#allocation3], 0  ;;  %s1416_s18 = smov [#allocation2]   ;;  %s1804_s0 = inlined_call_operand.vmem [shape: s32[8,16], index: 0, kind: input, shape index: {}]   ;;  %s1805_s1 = inlined_call_operand.vmem [shape: f32[8,48], index: 1, kind: input, shape index: {}]   ;;  %s1806_s2 = inlined_call_operand.vmem [shape: bf16[128,64], index: 2, kind: input, shape index: {}]   ;;  %s1807_s3 = inlined_call_operand.vmem [shape: bf16[288,128], index: 3, kind: input, shape index: {}]   ;;  %s1808_s4 = inlined_call_operand.hbm [shape: f32[8,128], index: 4, kind: input, shape index: {}]   ;;  %s1809_s5 = inlined_call_operand.vmem [shape: f32[8,128], index: 5, kind: output, shape index: {}]  }
   0x1   :  { %s25_s19 = sshll.u32 %s1416_s18, 4  ;;  %s26_s19 = int_to_ptr.vmem [resolvable:$true] %s25_s19 }
   0x2   :  { %s1402_s20 = scalar_lea.vmem %s26_s19, 128  ;;  %p1407_p1 = scmp.lt.s32.totalorder %s26_s19, %s26_s19 }
   0x3   :  { %p1403_p0 = scmp.ne.s32.totalorder %s26_s19, %s1402_s20  ;;  %p1408_p2 = scmp.lt.s32.totalorder %s1402_s20, %s1402_s20 }
   0x5   :  { %p1409_p3 = por %p1408_p2, %p1407_p1 }
   0x7   :  { %p1410_p4 = pnand %p1409_p3, %p1403_p0 }
   0x9   :  { %1413 = shalt.err (!%p1410_p4)
}
   0xa   :  { %28 = dma.hbm_to_vmem [thread:$0]  %s1808_s4, 128, %s26_s19, [#allocation3]  }
   0xb   :  { %1414 = dma.done.wait [#allocation3], 128  }
   0xc   :  { %1415 = vsyncadd [#allocation3], 4294967168  ;;  %v35_v0 = vlaneseq  ;;  %v1417_v1 = vmov 0.0   ;;  %v33_v7 = vld [vmem:[%s1804_s0] sm:$0xff]  ;;  %v1350_v17 = vld [vmem:[%s1806_s2 + $0x38] sm:$0xff]   ;;  %vm1418_vm0 = vmmov 0  }
   0xd   :  { %1265 = vmatprep.subr.bf16.mxu0 %v1417_v1  ;;  %1285 = vmatprep.subr.bf16.mxu1 %v1417_v1  ;;  %v1491_v11 = vld [vmem:[%s1805_s1] sm:$0xff]  ;;  %v1351_v20 = vld [vmem:[%s1806_s2 + $0x30] sm:$0xff]   ;;  %v1352_v25 = vld [vmem:[%s1806_s2 + $0x28] sm:$0xff]   ;;  %vm373_vm1 = vcmask 64512   ;;  %vm269_vm10 = vcmask 1041409   ;;  %vm271_vm11 = vcmask 1042434  }
   0xe   :  { %v1462_v2 = vshrl.u32 %v35_v0, 7  ;;  %1266 = vmatpush3.bf16.msra.mxu0 %v1350_v17  ;;  %v1353_v28 = vld [vmem:[%s1806_s2 + $0x20] sm:$0xff]   ;;  %v1354_v31 = vld [vmem:[%s1806_s2 + $0x18] sm:$0xff]   ;;  %v1355_v34 = vld [vmem:[%s1806_s2 + $0x10] sm:$0xff]   ;;  %1281 = vmatprep.mubr.msk.bf16.mxu0 %vm1418_vm0, %v1417_v1  ;;  %v374_v37 = vsel %vm373_vm1, %v1491_v11, 0.0  ;;  %v1619_v43 = vand.u32 127, %v35_v0 }
   0xf   :  { %1267 = vmatprep.subr.bf16.mxu0 %v1417_v1  ;;  %v1356_v35 = vld [vmem:[%s1806_s2 + $0x8] sm:$0xff]   ;;  %1293 = vmatprep.mubr.msk.bf16.mxu1 %vm1418_vm0, %v1417_v1  ;;  %v1357_v36 = vld [vmem:[%s1806_s2] sm:$0xff]   ;;  %v1358_v38 = vld [vmem:[%s1807_s3 + $0x18] sm:$0xff]   ;;  %vm273_vm12 = vcmask 1043459   ;;  %vm275_vm13 = vcmask 1044484   ;;  %vm277_vm14 = vcmask 1045509  }
  0x10   :  { %v1465_v3 = vsub.s32 2, %v1462_v2  ;;  %v1468_v4 = vsub.s32 0, %v1462_v2  ;;  %v1471_v5 = vsub.s32 3, %v1462_v2  ;;  %v1474_v6 = vsub.s32 1, %v1462_v2  ;;  %1286 = vmatpush3.bf16.msra.mxu1 %v1358_v38  ;;  %v1359_v39 = vld [vmem:[%s1807_s3 + $0x10] sm:$0xff]   ;;  %v1360_v40 = vld [vmem:[%s1807_s3 + $0x8] sm:$0xff]  }
  0x11   :  { %v1480_v8 = vsub.s32 4, %v1462_v2  ;;  %v1512_v16 = vsub.s32 5, %v1462_v2  ;;  %v1531_v21 = vsub.s32 6, %v1462_v2  ;;  %v1544_v24 = vsub.s32 7, %v1462_v2  ;;  %1287 = vmatprep.subr.bf16.mxu1 %v1417_v1  ;;  %s1419_s10 = smov 80   ;;  %s1421_s11 = smov 96  }
  0x12   :  { %v1483_v9 = vrot.slane %v33_v7, %v1465_v3  ;;  %v1486_v10 = vrot.slane %v33_v7, %v1468_v4  ;;  %v1496_v12 = vrot.slane %v33_v7, %v1471_v5  ;;  %v1499_v13 = vrot.slane %v33_v7, %v1474_v6  ;;  %1268 = vmatpush3.bf16.msra.mxu0 %v1351_v20  ;;  %s1425_s4 = smov 120  }
  0x13   :  { %v1505_v14 = vrot.slane %v1491_v11, %v1474_v6  ;;  %v1509_v15 = vrot.slane %v1491_v11, %v1468_v4  ;;  %v1521_v18 = vrot.slane %v1491_v11, %v1465_v3  ;;  %v1524_v19 = vrot.slane %v33_v7, %v1480_v8  ;;  %1269 = vmatprep.subr.bf16.mxu0 %v1417_v1 }
  0x14   :  { %56 = vbcast.lane.b32.xlu1 %v1483_v9, 256  ;;  %42 = vbcast.lane.b32.xlu0 %v1486_v10, 256  ;;  %v1537_v22 = vrot.slane %v1491_v11, %v1471_v5  ;;  %v1540_v23 = vrot.slane %v33_v7, %v1512_v16  ;;  %v1553_v26 = vrot.slane %v1491_v11, %v1480_v8  ;;  %vm279_vm15 = vcmask 1046534  }
  0x15   :  { %v1556_v27 = vrot.slane %v33_v7, %v1531_v21  ;;  %v1566_v29 = vrot.slane %v1491_v11, %v1512_v16  ;;  %v1569_v30 = vrot.slane %v33_v7, %v1544_v24  ;;  %v1579_v32 = vrot.slane %v1491_v11, %v1544_v24  ;;  %1288 = vmatpush3.bf16.msra.mxu1 %v1359_v39 }
  0x16   :  { %1270 = vmatpush3.bf16.msra.mxu0 %v1352_v25  ;;  %v1583_v33 = vrot.slane %v1491_v11, %v1531_v21  ;;  %1289 = vmatprep.subr.bf16.mxu1 %v1417_v1 }
  0x17   :  { %1271 = vmatprep.subr.bf16.mxu0 %v1417_v1 }
  0x18   :  { %63 = vbcast.lane.b32.xlu1 %v1496_v12, 256  ;;  %49 = vbcast.lane.b32.xlu0 %v1499_v13, 256 }
  0x19   :  { %1290 = vmatpush3.bf16.msra.mxu1 %v1360_v40 }
  0x1a   :  { %1272 = vmatpush3.bf16.msra.mxu0 %v1353_v28  ;;  %1291 = vmatprep.subr.bf16.mxu1 %v1417_v1 }
  0x1b   :  { %1273 = vmatprep.subr.bf16.mxu0 %v1417_v1 }
  0x1c   :  { %129 = vbcast.lane.b32.xlu1 %v1505_v14, 256  ;;  %122 = vbcast.lane.b32.xlu0 %v1509_v15, 256 }
  0x1e   :  { %1274 = vmatpush3.bf16.msra.mxu0 %v1354_v31 }
  0x1f   :  { %1275 = vmatprep.subr.bf16.mxu0 %v1417_v1 }
  0x20   :  { %136 = vbcast.lane.b32.xlu1 %v1521_v18, 256  ;;  %70 = vbcast.lane.b32.xlu0 %v1524_v19, 256 }
  0x22   :  { %1276 = vmatpush3.bf16.msra.mxu0 %v1355_v34 }
  0x23   :  { %1277 = vmatprep.subr.bf16.mxu0 %v1417_v1 }
  0x24   :  { %143 = vbcast.lane.b32.xlu1 %v1537_v22, 256  ;;  %77 = vbcast.lane.b32.xlu0 %v1540_v23, 256 }
  0x26   :  { %1278 = vmatpush3.bf16.msra.mxu0 %v1356_v35 }
  0x27   :  { %1279 = vmatprep.subr.bf16.mxu0 %v1417_v1 }
  0x28   :  { %150 = vbcast.lane.b32.xlu1 %v1553_v26, 256  ;;  %84 = vbcast.lane.b32.xlu0 %v1556_v27, 256 }
  0x2a   :  { %1280 = vmatpush3.bf16.msra.mxu0 %v1357_v36 }
  0x2b   :  { %1317 = vmatprep.subr.bf16.mxu0 %v1417_v1 }
  0x2c   :  { %157 = vbcast.lane.b32.xlu1 %v1566_v29, 256  ;;  %91 = vbcast.lane.b32.xlu0 %v1569_v30, 256 }
  0x30   :  { %171 = vbcast.lane.b32.xlu1 %v1579_v32, 256  ;;  %164 = vbcast.lane.b32.xlu0 %v1583_v33, 256 }
  0x34   :  { %602 = vrot.lane.b32.xlu1 %v1491_v11, %s1419_s10 }
  0x4f   :  { %375 = vadd.xlane.f32.xlu0 %v374_v37 }
  0x86   :  { %v57_v41 = vpop.permute.xlu1 %56  ;;  %v43_v42 = vpop.permute.xlu0 %42 }
  0x87   :  { %vm93_vm2 = vcmp.eq.s32.totalorder %v1619_v43, %v43_v42  ;;  %vm95_vm4 = vcmp.eq.s32.totalorder %v1619_v43, %v57_v41 }
  0x88   :  { %v1185_v48 = vsel %vm93_vm2, 1.0, %v1417_v1  ;;  %v1187_v54 = vsel %vm95_vm4, 1.0, %v1417_v1  ;;  %vm281_vm2 = vcmask 1047559   ;;  %vm584_vm4 = vcmask 261120  }
  0x8a   :  { %v64_v44 = vpop.permute.xlu1 %63  ;;  %v50_v45 = vpop.permute.xlu0 %49 }
  0x8b   :  { %vm94_vm3 = vcmp.eq.s32.totalorder %v1619_v43, %v50_v45  ;;  %vm96_vm5 = vcmp.eq.s32.totalorder %v1619_v43, %v64_v44 }
  0x8c   :  { %v1186_v47 = vsel %vm94_vm3, 1.0, %v1417_v1  ;;  %v1188_v61 = vsel %vm96_vm5, 1.0, %v1417_v1  ;;  %vm435_vm3 = vcmask 523264  }
  0x8e   :  { %v130_v46 = vpop.permute.xlu1 %129  ;;  %v123_v49 = vpop.permute.xlu0 %122 }
  0x8f   :  { %v174_v50 = vmul.f32 %v1186_v47, %v130_v46  ;;  %v173_v51 = vmul.f32 %v1185_v48, %v123_v49 }
  0x91   :  { %v187_v52 = vrot.slane %v174_v50, 4  ;;  %v181_v53 = vrot.slane %v173_v51, 4 }
  0x92   :  { %v137_v55 = vpop.permute.xlu1 %136  ;;  %v71_v56 = vpop.permute.xlu0 %70 }
  0x93   :  { %v188_v57 = vadd.f32 %v187_v52, %v174_v50  ;;  %v175_v58 = vmul.f32 %v1187_v54, %v137_v55  ;;  %v182_v59 = vadd.f32 %v181_v53, %v173_v51  ;;  %vm97_vm6 = vcmp.eq.s32.totalorder %v1619_v43, %v71_v56 }
  0x94   :  { %v1189_v37 = vsel %vm97_vm6, 1.0, %v1417_v1 }
  0x95   :  { %v193_v60 = vrot.slane %v175_v58, 4  ;;  %v189_v0 = vrot.slane %v188_v57, 2  ;;  %v183_v20 = vrot.slane %v182_v59, 2 }
  0x96   :  { %v144_v62 = vpop.permute.xlu1 %143  ;;  %v78_v63 = vpop.permute.xlu0 %77 }
  0x97   :  { %v194_v7 = vadd.f32 %v193_v60, %v175_v58  ;;  %v176_v17 = vmul.f32 %v1188_v61, %v144_v62  ;;  %v190_v35 = vadd.f32 %v189_v0, %v188_v57  ;;  %v184_v38 = vadd.f32 %v183_v20, %v182_v59 }
  0x98   :  { %vm98_vm7 = vcmp.eq.s32.totalorder %v1619_v43, %v78_v63 }
  0x99   :  { %v195_v25 = vrot.slane %v194_v7, 2  ;;  %v199_v28 = vrot.slane %v176_v17, 4  ;;  %v191_v46 = vrot.slane %v190_v35, 1  ;;  %v1190_v48 = vsel %vm98_vm7, 1.0, %v1417_v1 }
  0x9a   :  { %v151_v31 = vpop.permute.xlu1 %150  ;;  %v85_v34 = vpop.permute.xlu0 %84  ;;  %v185_v49 = vrot.slane %v184_v38, 1 }
  0x9b   :  { %v200_v36 = vadd.f32 %v199_v28, %v176_v17  ;;  %v177_v39 = vmul.f32 %v1189_v37, %v151_v31  ;;  %v196_v40 = vadd.f32 %v195_v25, %v194_v7  ;;  %vm99_vm8 = vcmp.eq.s32.totalorder %v1619_v43, %v85_v34 }
  0x9c   :  { %v1191_v53 = vsel %vm99_vm8, 1.0, %v1417_v1  ;;  %v192_v62 = vadd.f32 %v191_v46, %v190_v35  ;;  %v186_v63 = vadd.f32 %v185_v49, %v184_v38 }
  0x9d   :  { %v201_v41 = vrot.slane %v200_v36, 2  ;;  %v205_v42 = vrot.slane %v177_v39, 4  ;;  %v197_v52 = vrot.slane %v196_v40, 1 }
  0x9e   :  { %v158_v44 = vpop.permute.xlu1 %157  ;;  %v92_v45 = vpop.permute.xlu0 %91 }
  0x9f   :  { %v202_v47 = vadd.f32 %v201_v41, %v200_v36  ;;  %v206_v50 = vadd.f32 %v205_v42, %v177_v39  ;;  %v178_v51 = vmul.f32 %v1190_v48, %v158_v44  ;;  %vm100_vm9 = vcmp.eq.s32.totalorder %v1619_v43, %v92_v45 }
  0xa0   :  { %v1192_v58 = vsel %vm100_vm9, 1.0, %v1417_v1  ;;  %v198_v17 = vadd.f32 %v197_v52, %v196_v40  ;;  %v230_v39 = vpack.c.bf16 %v192_v62, %v192_v62  ;;  %v229_v41 = vpack.c.bf16 %v186_v63, %v186_v63 }
  0xa1   :  { %v203_v54 = vrot.slane %v202_v47, 1  ;;  %v207_v55 = vrot.slane %v206_v50, 2  ;;  %v211_v56 = vrot.slane %v178_v51, 4 }
  0xa2   :  { %v172_v57 = vpop.permute.xlu1 %171  ;;  %v165_v59 = vpop.permute.xlu0 %164  ;;  %v231_v45 = vpack.c.bf16 %v198_v17, %v198_v17  ;;  %v262_v40 = vunpack.c.l.b16 %v230_v39  ;;  %v1361_v39 = vld [vmem:[%s1807_s3] sm:$0xff]  }
  0xa3   :  { %v180_v60 = vmul.f32 %v1192_v58, %v172_v57  ;;  %v179_v61 = vmul.f32 %v1191_v53, %v165_v59  ;;  %v208_v0 = vadd.f32 %v207_v55, %v206_v50  ;;  %v212_v7 = vadd.f32 %v211_v56, %v178_v51  ;;  %1292 = vmatpush3.bf16.msra.mxu1 %v1361_v39 }
  0xa4   :  { %v204_v28 = vadd.f32 %v203_v54, %v202_v47  ;;  %v261_v50 = vunpack.c.l.b16 %v229_v41  ;;  %v263_v47 = vunpack.c.l.b16 %v231_v45  ;;  %1297 = vmatprep.subr.bf16.mxu1 %v1417_v1 }
  0xa5   :  { %v223_v20 = vrot.slane %v180_v60, 4  ;;  %v217_v25 = vrot.slane %v179_v61, 4  ;;  %v209_v31 = vrot.slane %v208_v0, 1  ;;  %v213_v34 = vrot.slane %v212_v7, 2 }
  0xa6   :  { %v232_v53 = vpack.c.bf16 %v204_v28, %v204_v28 }
  0xa7   :  { %v224_v36 = vadd.f32 %v223_v20, %v180_v60  ;;  %v218_v37 = vadd.f32 %v217_v25, %v179_v61  ;;  %v210_v42 = vadd.f32 %v209_v31, %v208_v0  ;;  %v214_v44 = vadd.f32 %v213_v34, %v212_v7 }
  0xa8   :  { %v264_v55 = vunpack.c.l.b16 %v232_v53  ;;  %v270_v61 = vsel %vm269_vm10, %v262_v40, %v261_v50  ;;  %v1362_v53 = vld [vmem:[%s1807_s3 + $0x58] sm:$0xff]   ;;  %v1364_v40 = vld [vmem:[%s1807_s3 + $0x48] sm:$0xff]   ;;  %v1365_v50 = vld [vmem:[%s1807_s3 + $0x40] sm:$0xff]  }
  0xa9   :  { %v225_v48 = vrot.slane %v224_v36, 2  ;;  %v219_v57 = vrot.slane %v218_v37, 2  ;;  %v215_v35 = vrot.slane %v214_v44, 1  ;;  %v233_v38 = vpack.c.bf16 %v210_v42, %v210_v42 }
  0xaa   :  { %v272_v63 = vsel %vm271_vm11, %v263_v47, %v270_v61  ;;  %v1367_v47 = vld [vmem:[%s1807_s3 + $0x30] sm:$0xff]  }
  0xab   :  { %v226_v46 = vadd.f32 %v225_v48, %v224_v36  ;;  %v220_v49 = vadd.f32 %v219_v57, %v218_v37  ;;  %v216_v51 = vadd.f32 %v215_v35, %v214_v44  ;;  %v265_v58 = vunpack.c.l.b16 %v233_v38 }
  0xac   :  { %v274_v17 = vsel %vm273_vm12, %v264_v55, %v272_v63  ;;  %v1201_v55 = vld [vmem:[#allocation2] ss:$0 sm:$0xff] }
  0xad   :  { %v227_v52 = vrot.slane %v226_v46, 1  ;;  %v221_v54 = vrot.slane %v220_v49, 1  ;;  %v234_v56 = vpack.c.bf16 %v216_v51, %v216_v51  ;;  %v276_v28 = vsel %vm275_vm13, %v265_v58, %v274_v17  ;;  %v1366_v51 = vld [vmem:[%s1807_s3 + $0x38] sm:$0xff]  }
  0xaf   :  { %v228_v59 = vadd.f32 %v227_v52, %v226_v46  ;;  %v222_v60 = vadd.f32 %v221_v54, %v220_v49  ;;  %v266_v62 = vunpack.c.l.b16 %v234_v56  ;;  %v1363_v49 = vld [vmem:[%s1807_s3 + $0x50] sm:$0xff]   ;;  %v1368_v52 = vld [vmem:[%s1807_s3 + $0x28] sm:$0xff]   ;;  %v1369_v54 = vld [vmem:[%s1807_s3 + $0x20] sm:$0xff]  }
  0xb1   :  { %v236_v0 = vpack.c.bf16 %v228_v59, %v228_v59  ;;  %v235_v7 = vpack.c.bf16 %v222_v60, %v222_v60  ;;  %v278_v31 = vsel %vm277_vm14, %v266_v62, %v276_v28 }
  0xb3   :  { %v268_v20 = vunpack.c.l.b16 %v236_v0  ;;  %v267_v25 = vunpack.c.l.b16 %v235_v7  ;;  %v1420_v0 = vmov 32   ;;  %v1207_v7 = vld [vmem:[#allocation2 + $0x1] ss:$0 sm:$0xff] }
  0xb4   :  { %1347 = vset.pattern.permute.xlu0 %v1420_v0 }
  0xb5   :  { %v280_v34 = vsel %vm279_vm15, %v267_v25, %v278_v31 }
  0xb6   :  { %v282_v36 = vsel %vm281_vm2, %v268_v20, %v280_v34 }
  0xb7   :  { %v283_v37 = vpack.c.b16 %v282_v36, %v282_v36 }
  0xb9   :  { %1282 = vmatmul.mubr.bf16.vlgmr.msra.gmra.mxu0 %v283_v37 }
  0xba   :  { %1325 = vmatprep.mubr.msk.bf16.mxu0 %vm1418_vm0, %v1417_v1 }
  0xd8   :  { %v376_v41 = vpop.xlane.xlu0 %375 }
  0xd9   :  { %v377_v42 = vadd.f32 1e-08, %v376_v41 }
  0xdb   :  { %1376 = vrcp.f32 %v377_v42  ;;  %v603_v42 = vpop.permute.xlu1 %602 }
  0xe8   :  { %v1377_v44 = vpop.eup %1376 }
 0x179   :  { %v367_v45 = vpop.f32.mrf.mxu0 }
 0x17a   :  { %v379_v48 = vmul.f32 %v1377_v44, %v367_v45 }
 0x17b   :  { %v1283_v57 = vpop.f32.mrf.mxu0 }
 0x17c   :  { %v406_v35 = vpack.c.bf16 %v379_v48, %v379_v48 }
 0x17d   :  { %v370_v38 = vpop.f32.mrf.mxu0 }
 0x17e   :  { %1294 = vmatmul.mubr.msk.bf16.vlgmr.msra.gmra.mxu1 %vm435_vm3, %v406_v35 }
 0x17f   :  { %v1284_v46 = vpop.f32.mrf.mxu0  ;;  %1298 = vmatpush3.bf16.msra.mxu1 %v1362_v53  ;;  %1313 = vmatprep.mubr.msk.bf16.mxu1 %vm1418_vm0, %v1417_v1 }
 0x180   :  { %1299 = vmatprep.subr.bf16.mxu1 %v1417_v1 }
 0x183   :  { %1300 = vmatpush3.bf16.msra.mxu1 %v1363_v49 }
 0x184   :  { %1301 = vmatprep.subr.bf16.mxu1 %v1417_v1 }
 0x187   :  { %1302 = vmatpush3.bf16.msra.mxu1 %v1364_v40 }
 0x188   :  { %1303 = vmatprep.subr.bf16.mxu1 %v1417_v1 }
 0x18b   :  { %1304 = vmatpush3.bf16.msra.mxu1 %v1365_v50 }
 0x18c   :  { %1305 = vmatprep.subr.bf16.mxu1 %v1417_v1 }
 0x18f   :  { %1306 = vmatpush3.bf16.msra.mxu1 %v1366_v51 }
 0x190   :  { %1307 = vmatprep.subr.bf16.mxu1 %v1417_v1 }
 0x193   :  { %1308 = vmatpush3.bf16.msra.mxu1 %v1367_v47 }
 0x194   :  { %1309 = vmatprep.subr.bf16.mxu1 %v1417_v1 }
 0x197   :  { %1310 = vmatpush3.bf16.msra.mxu1 %v1368_v52 }
 0x198   :  { %1311 = vmatprep.subr.bf16.mxu1 %v1417_v1 }
 0x19b   :  { %1312 = vmatpush3.bf16.msra.mxu1 %v1369_v54 }
 0x23e   :  { %v473_v56 = vpop.f32.mrf.mxu1 }
 0x23f   :  { %v474_v58 = vadd.f32 %v1201_v55, %v473_v56 }
 0x240   :  { %v1295_v59 = vpop.f32.mrf.mxu1 }
 0x241   :  { %v479_v60 = vmax.f32 %v474_v58, 0.0 }
 0x242   :  { %v476_v61 = vpop.f32.mrf.mxu1 }
 0x243   :  { %v480_v62 = vpack.c.bf16 %v479_v60, %v479_v60  ;;  %v1374_v60 = vld [vmem:[%s1807_s3 + $0x88] sm:$0xff]  }
 0x244   :  { %v1296_v63 = vpop.f32.mrf.mxu1 }
 0x245   :  { %1314 = vmatmul.mubr.bf16.vlgmr.msra.gmra.mxu1 %v480_v62  ;;  %v1375_v62 = vld [vmem:[%s1807_s3 + $0x80] sm:$0xff]  }
 0x246   :  { %v1216_v63 = vld [vmem:[#allocation2 + $0x2] ss:$0 sm:$0xff] }
 0x305   :  { %v567_v17 = vpop.f32.mrf.mxu1 }
 0x306   :  { %v1685_v20 = vadd.f32 %v1207_v7, %v567_v17 }
 0x307   :  { %v1315_v25 = vpop.f32.mrf.mxu1 }
 0x308   :  { %v598_v28 = vmul.f32 0.5, %v1685_v20  ;;  %v574_v31 = vand.u32 2147483647, %v1685_v20  ;;  %v573_v35 = vmax.f32 %v1685_v20, 0.0  ;;  %v1694_v50 = vmul.f32 %v1685_v20, %v1685_v20 }
 0x309   :  { %v570_v34 = vpop.f32.mrf.mxu1 }
 0x30a   :  { %v599_v36 = vmul.f32 1.442695, %v598_v28  ;;  %v575_v37 = vsub.f32 0.0, %v574_v31  ;;  %v585_v51 = vsel %vm584_vm4, %v1694_v50, 0.0 }
 0x30b   :  { %v1316_v39 = vpop.f32.mrf.mxu1 }
 0x30c   :  { %1378 = vpow2.f32 %v599_v36  ;;  %v576_v41 = vmul.f32 1.442695, %v575_v37  ;;  %v1422_v37 = vmov 1966171168  }
 0x30d   :  { %v832_v39 = vunpack.c.l.s4 %v1422_v37 }
 0x30e   :  { %1380 = vpow2.f32 %v576_v41 }
 0x319   :  { %v1379_v44 = vpop.eup %1378 }
 0x31a   :  { %v605_v45 = vmul.f32 %v1379_v44, %v603_v42  ;;  %v833_v42 = vunpack.c.0.s8 %v832_v39  ;;  %v1222_v44 = vld [vmem:[#allocation2 + $0x3] ss:$0 sm:$0xff] }
 0x31b   :  { %v1381_v48 = vpop.eup %1380 }
 0x31c   :  { %607 = vrot.lane.b32.xlu1 %v605_v45, %s1421_s11  ;;  %v578_v57 = vadd.f32 1.0, %v1381_v48  ;;  %v836_v45 = vsub.s32 %v833_v42, %v1462_v2 }
 0x31e   :  { %1382 = vlog2.f32 %v578_v57 }
 0x32b   :  { %v1383_v53 = vpop.eup %1382 }
 0x32c   :  { %v580_v38 = vmul.f32 0.6931472, %v1383_v53 }
 0x32e   :  { %v581_v46 = vadd.f32 %v580_v38, %v573_v35 }
 0x330   :  { %v582_v49 = vadd.f32 1.0, %v581_v46 }
 0x332   :  { %v591_v40 = vmul.f32 0.0, %v582_v49 }
 0x334   :  { %594 = vperm.xlu0 %1347, %v591_v40  }
 0x338   :  { %775 = vbcast.lane.b32.xlu0 %v1486_v10, 264  ;;  %v1370_v10 = vld [vmem:[%s1807_s3 + $0x78] sm:$0xff]  }
 0x339   :  { %1318 = vmatpush3.bf16.msra.mxu0 %v1370_v10 }
 0x33a   :  { %1319 = vmatprep.subr.bf16.mxu0 %v1417_v1 }
 0x33c   :  { %779 = vbcast.lane.b32.xlu0 %v1499_v13, 264  ;;  %v1371_v13 = vld [vmem:[%s1807_s3 + $0x70] sm:$0xff]  }
 0x33d   :  { %1320 = vmatpush3.bf16.msra.mxu0 %v1371_v13 }
 0x33e   :  { %1321 = vmatprep.subr.bf16.mxu0 %v1417_v1 }
 0x340   :  { %586 = vadd.xlane.f32.xlu1 %v585_v51  ;;  %783 = vbcast.lane.b32.xlu0 %v1483_v9, 264  ;;  %v1372_v9 = vld [vmem:[%s1807_s3 + $0x68] sm:$0xff]  }
 0x341   :  { %1322 = vmatpush3.bf16.msra.mxu0 %v1372_v9 }
 0x342   :  { %1323 = vmatprep.subr.bf16.mxu0 %v1417_v1 }
 0x344   :  { %787 = vbcast.lane.b32.xlu0 %v1496_v12, 264  ;;  %v1373_v12 = vld [vmem:[%s1807_s3 + $0x60] sm:$0xff]   ;;  %s1423_s3 = smov 32  }
 0x345   :  { %1324 = vmatpush3.bf16.msra.mxu0 %v1373_v12 }
 0x346   :  { %1329 = vmatprep.subr.bf16.mxu0 %v1417_v1 }
 0x348   :  { %791 = vbcast.lane.b32.xlu0 %v1524_v19, 264 }
 0x34c   :  { %795 = vbcast.lane.b32.xlu0 %v1540_v23, 264 }
 0x350   :  { %803 = vbcast.lane.b32.xlu0 %v1569_v30, 264 }
 0x38e   :  { %v608_v19 = vpop.permute.xlu1 %607 }
 0x38f   :  { %v610_v23 = vadd.f32 %v608_v19, %v1685_v20 }
 0x391   :  { %612 = vrot.lane.b32.xlu1 %v610_v23, %s1421_s11 }
 0x3af   :  { %v595_v55 = vpop.permute.xlu0 %594 }
 0x3b3   :  { %v776_v36 = vpop.permute.xlu0 %775 }
 0x3b4   :  { %vm805_vm9 = vcmp.eq.s32.totalorder %v1619_v43, %v776_v36 }
 0x3b5   :  { %v1226_v42 = vsel %vm805_vm9, 1.0, %v1417_v1 }
 0x3b7   :  { %v780_v41 = vpop.permute.xlu0 %779 }
 0x3bb   :  { %v784_v48 = vpop.permute.xlu0 %783 }
 0x3bc   :  { %vm807_vm5 = vcmp.eq.s32.totalorder %v1619_v43, %v784_v48 }
 0x3bf   :  { %v788_v10 = vpop.permute.xlu0 %787 }
 0x3c0   :  { %vm808_vm7 = vcmp.eq.s32.totalorder %v1619_v43, %v788_v10 }
 0x3c9   :  { %v587_v30 = vpop.xlane.xlu1 %586 }
 0x3ca   :  { %v588_v47 = vadd.f32 1e-08, %v587_v30 }
 0x3cc   :  { %1384 = vrsqrt.f32 %v588_v47 }
 0x3d9   :  { %v1385_v52 = vpop.eup %1384 }
 0x3da   :  { %v590_v54 = vmul.f32 %v1385_v52, %v1685_v20 }
 0x3dc   :  { %v597_v56 = vadd.f32 %v595_v55, %v590_v54  ;;  %v1228_v55 = vsel %vm807_vm5, 1.0, %v1417_v1 }
 0x403   :  { %v613_v58 = vpop.permute.xlu1 %612 }
 0x404   :  { %v1724_v59 = vsel %vm584_vm4, %v597_v56, %v613_v58  ;;  %v792_v56 = vpop.permute.xlu0 %791 }
 0x405   :  { %v630_v61 = vpack.c.bf16 %v1724_v59, %v1724_v59  ;;  %vm809_vm6 = vcmp.eq.s32.totalorder %v1619_v43, %v792_v56 }
 0x407   :  { %1326 = vmatmul.mubr.msk.bf16.vlgmr.msra.gmra.mxu0 %vm435_vm3, %v630_v61 }
 0x408   :  { %1330 = vmatpush3.bf16.msra.mxu0 %v1374_v60  ;;  %1333 = vmatprep.mubr.msk.bf16.mxu0 %vm1418_vm0, %v1417_v1  ;;  %vm806_vm0 = vcmp.eq.s32.totalorder %v1619_v43, %v780_v41 }
 0x409   :  { %1331 = vmatprep.subr.bf16.mxu0 %v1417_v1  ;;  %v1227_v23 = vsel %vm806_vm0, 1.0, %v1417_v1 }
 0x40c   :  { %1332 = vmatpush3.bf16.msra.mxu0 %v1375_v62 }
 0x4c7   :  { %v696_v0 = vpop.f32.mrf.mxu0 }
 0x4c8   :  { %v697_v7 = vadd.f32 %v1216_v63, %v696_v0  ;;  %v1230_v63 = vsel %vm809_vm6, 1.0, %v1417_v1 }
 0x4c9   :  { %v1327_v17 = vpop.f32.mrf.mxu0 }
 0x4ca   :  { %v702_v25 = vmax.f32 %v697_v7, 0.0 }
 0x4cb   :  { %v699_v28 = vpop.f32.mrf.mxu0 }
 0x4cc   :  { %v703_v31 = vpack.c.bf16 %v702_v25, %v702_v25  ;;  %v1229_v25 = vsel %vm808_vm7, 1.0, %v1417_v1  ;;  %v796_v28 = vpop.permute.xlu0 %795 }
 0x4cd   :  { %v1328_v34 = vpop.f32.mrf.mxu0  ;;  %vm810_vm8 = vcmp.eq.s32.totalorder %v1619_v43, %v796_v28 }
 0x4ce   :  { %1334 = vmatmul.mubr.msk.bf16.vlgmr.msra.gmra.mxu0 %vm584_vm4, %v703_v31  ;;  %v1231_v37 = vsel %vm810_vm8, 1.0, %v1417_v1 }
 0x4d0   :  { %v804_v36 = vpop.permute.xlu0 %803 }
 0x4d1   :  { %vm812_vm5 = vcmp.eq.s32.totalorder %v1619_v43, %v804_v36 }
 0x58e   :  { %v757_v57 = vpop.f32.mrf.mxu0 }
 0x58f   :  { %v758_v53 = vadd.f32 %v1222_v44, %v757_v57 }
 0x590   :  { %v1335_v35 = vpop.f32.mrf.mxu0 }
 0x591   :  { %v830_v38 = vcombine.high %v758_v53, %v758_v53  ;;  %v837_v46 = vrot.slane %v758_v53, %v836_v45  ;;  %763 = vmax.xlane.f32.xlu1 %v758_v53 }
 0x592   :  { %v760_v49 = vpop.f32.mrf.mxu0 }
 0x593   :  { %v845_v40 = vcombine.high %v837_v46, %v837_v46  ;;  %v853_v51 = vrot.slane %v837_v46, %v836_v45  ;;  %v844_v19 = vrot.slane %v830_v38, %v836_v45 }
 0x594   :  { %v1336_v13 = vpop.f32.mrf.mxu0 }
 0x595   :  { %v867_v9 = vrot.slane %v845_v40, %v836_v45  ;;  %v875_v12 = vcombine.high %v853_v51, %v853_v51  ;;  %v860_v54 = vrot.slane %v844_v19, %v836_v45  ;;  %v846_v62 = vcombine.high %v844_v19, %v844_v19 }
 0x596   :  { %v882_v41 = vrot.slane %v853_v51, %v1468_v4 }
 0x597   :  { %v886_v30 = vrot.slane %v867_v9, %v1468_v4  ;;  %v890_v52 = vrot.slane %v875_v12, %v1468_v4  ;;  %v898_v60 = vrot.slane %v860_v54, %v1468_v4  ;;  %v877_v61 = vcombine.high %v867_v9, %v867_v9 }
 0x598   :  { %v874_v17 = vrot.slane %v846_v62, %v836_v45  ;;  %v919_v44 = vmul.f32 %v1226_v42, %v882_v41  ;;  %v876_v48 = vcombine.high %v860_v54, %v860_v54 }
 0x599   :  { %v920_v47 = vmul.f32 %v1227_v23, %v886_v30  ;;  %v921_v58 = vmul.f32 %v1228_v55, %v890_v52  ;;  %v923_v0 = vmul.f32 %v1230_v63, %v898_v60  ;;  %v894_v7 = vrot.slane %v877_v61, %v1468_v4 }
 0x59a   :  { %v902_v34 = vrot.slane %v874_v17, %v1468_v4  ;;  %v906_v38 = vrot.slane %v876_v48, %v1468_v4  ;;  %v878_v40 = vcombine.high %v874_v17, %v874_v17  ;;  %v1163_v52 = vmul.f32 1.442695, %v1685_v20 }
 0x59b   :  { %929 = vadd.xlane.f32.xlu0 %v920_v47  ;;  %v922_v31 = vmul.f32 %v1229_v25, %v894_v7 }
 0x59c   :  { %v924_v39 = vmul.f32 %v1231_v37, %v902_v34  ;;  %v910_v51 = vrot.slane %v878_v40, %v1468_v4 }
 0x59f   :  { %931 = vadd.xlane.f32.xlu0 %v921_v58 }
 0x5a2   :  { %799 = vbcast.lane.b32.xlu1 %v1556_v27, 264 }
 0x5a3   :  { %935 = vadd.xlane.f32.xlu0 %v923_v0 }
 0x5a7   :  { %933 = vadd.xlane.f32.xlu0 %v922_v31 }
 0x5ab   :  { %937 = vadd.xlane.f32.xlu0 %v924_v39  ;;  %v1157_v39 = vadd.f32 1.0, %v1685_v20 }
 0x5c6   :  { %927 = vadd.xlane.f32.xlu1 %v919_v44 }
 0x61a   :  { %v764_v27 = vpop.xlane.xlu1 %763 }
 0x61b   :  { %v765_v45 = vsub.f32 %v758_v53, %v764_v27  ;;  %v1233_v53 = vsel %vm812_vm5, 1.0, %v1417_v1 }
 0x61c   :  { %v926_v13 = vmul.f32 %v1233_v53, %v910_v51 }
 0x61d   :  { %v766_v57 = vmul.f32 1.442695, %v765_v45 }
 0x61e   :  { %v800_v35 = vpop.permute.xlu1 %799 }
 0x61f   :  { %1386 = vpow2.f32 %v766_v57  ;;  %vm811_vm0 = vcmp.eq.s32.totalorder %v1619_v43, %v800_v35 }
 0x620   :  { %v1232_v46 = vsel %vm811_vm0, 1.0, %v1417_v1  ;;  %v1424_v1 = vmov 0  }
 0x621   :  { %v925_v49 = vmul.f32 %v1232_v46, %v906_v38  ;;  %1348 = vset.pattern.permute.xlu1 %v1424_v1  ;;  %1349 = vset.pattern.permute.xlu0 %v1424_v1 }
 0x623   :  { %939 = vadd.xlane.f32.xlu1 %v925_v49 }
 0x62c   :  { %v1387_v10 = vpop.eup %1386 }
 0x62d   :  { %768 = vadd.xlane.f32.xlu0 %v1387_v10 }
 0x631   :  { %941 = vadd.xlane.f32.xlu0 %v926_v13 }
 0x634   :  { %1006 = vbcast.lane.b32.xlu1 %v1509_v15, 264  ;;  %v930_v15 = vpop.xlane.xlu0 %929 }
 0x638   :  { %1022 = vbcast.lane.b32.xlu1 %v1521_v18, 264  ;;  %v932_v18 = vpop.xlane.xlu0 %931 }
 0x63c   :  { %1030 = vbcast.lane.b32.xlu1 %v1537_v22, 264  ;;  %v936_v22 = vpop.xlane.xlu0 %935 }
 0x640   :  { %1038 = vbcast.lane.b32.xlu1 %v1553_v26, 264 }
 0x644   :  { %1054 = vbcast.lane.b32.xlu1 %v1583_v33, 264  ;;  %v934_v33 = vpop.xlane.xlu0 %933 }
 0x647   :  { %1014 = vbcast.lane.b32.xlu0 %v1505_v14, 264 }
 0x648   :  { %1159 = vrot.lane.b32.xlu1 %v1694_v50, %s1423_s3  ;;  %v938_v9 = vpop.xlane.xlu0 %937 }
 0x64b   :  { %1046 = vbcast.lane.b32.xlu0 %v1566_v29, 264 }
 0x64f   :  { %1062 = vbcast.lane.b32.xlu0 %v1579_v32, 264  ;;  %v928_v26 = vpop.xlane.xlu1 %927 }
 0x653   :  { %992 = vrot.lane.b32.xlu0 %v1491_v11, %s1425_s4 }
 0x6ac   :  { %v940_v14 = vpop.xlane.xlu1 %939 }
 0x6b0   :  { %v1007_v12 = vpop.permute.xlu1 %1006 }
 0x6b4   :  { %v1023_v50 = vpop.permute.xlu1 %1022 }
 0x6b6   :  { %v769_v19 = vpop.xlane.xlu0 %768 }
 0x6b7   :  { %1388 = vlog2.f32 %v769_v19 }
 0x6b8   :  { %v1031_v29 = vpop.permute.xlu1 %1030  ;;  %1390 = vpow2.f32 %v1163_v52 }
 0x6ba   :  { %v942_v54 = vpop.xlane.xlu0 %941 }
 0x6bc   :  { %v1039_v30 = vpop.permute.xlu1 %1038 }
 0x6be   :  { %v1015_v7 = vpop.permute.xlu0 %1014 }
 0x6c0   :  { %v1055_v60 = vpop.permute.xlu1 %1054 }
 0x6c4   :  { %v1389_v23 = vpop.eup %1388  ;;  %v1160_v34 = vpop.permute.xlu1 %1159 }
 0x6c5   :  { %v771_v32 = vmul.f32 0.6931472, %v1389_v23  ;;  %v1391_v45 = vpop.eup %1390 }
 0x6c7   :  { %v772_v47 = vadd.f32 %v771_v32, %v764_v27 }
 0x6c9   :  { %v963_v11 = vrot.slane %v772_v47, %v1480_v8  ;;  %v951_v55 = vrot.slane %v772_v47, %v1474_v6  ;;  %v947_v56 = vrot.slane %v772_v47, %v1468_v4  ;;  %v955_v58 = vrot.slane %v772_v47, %v1465_v3 }
 0x6ca   :  { %v959_v63 = vrot.slane %v772_v47, %v1471_v5  ;;  %v971_v0 = vrot.slane %v772_v47, %v1531_v21  ;;  %v967_v6 = vrot.slane %v772_v47, %v1512_v16  ;;  %v1162_v5 = vsub.f32 %v1157_v39, %v1160_v34  ;;  %v1047_v21 = vpop.permute.xlu0 %1046 }
 0x6cb   :  { %v985_v61 = vsub.f32 %v930_v15, %v951_v55  ;;  %v984_v62 = vsub.f32 %v928_v26, %v947_v56  ;;  %v988_v17 = vsub.f32 %v936_v22, %v963_v11  ;;  %v986_v31 = vsub.f32 %v932_v18, %v955_v58 }
 0x6cc   :  { %v987_v4 = vsub.f32 %v934_v33, %v959_v63  ;;  %v990_v3 = vsub.f32 %v940_v14, %v971_v0  ;;  %v975_v42 = vrot.slane %v772_v47, %v1544_v24  ;;  %v989_v27 = vsub.f32 %v938_v9, %v967_v6 }
 0x6cd   :  { %v1073_v25 = vmul.f32 %v1015_v7, %v985_v61  ;;  %v1072_v28 = vmul.f32 %v1007_v12, %v984_v62  ;;  %v1076_v8 = vmul.f32 %v1039_v30, %v988_v17  ;;  %v1074_v37 = vmul.f32 %v1023_v50, %v986_v31 }
 0x6ce   :  { %v1075_v41 = vmul.f32 %v1031_v29, %v987_v4  ;;  %v1078_v44 = vmul.f32 %v1055_v60, %v990_v3  ;;  %v991_v16 = vsub.f32 %v942_v54, %v975_v42  ;;  %v1165_v48 = vsub.f32 %v1162_v5, %v1391_v45  ;;  %v1063_v35 = vpop.permute.xlu0 %1062 }
 0x6cf   :  { %1089 = vperm.xlu1 %1348, %v1072_v28   ;;  %1092 = vperm.xlu0 %1349, %v1073_v25   ;;  %v1077_v57 = vmul.f32 %v1047_v21, %v989_v27  ;;  %v1114_v24 = vsub.s32 %v1619_v43, %v1462_v2 }
 0x6d0   :  { %v1079_v20 = vmul.f32 %v1063_v35, %v991_v16 }
 0x6d2   :  { %v993_v38 = vpop.permute.xlu0 %992 }
 0x6d3   :  { %1095 = vperm.xlu1 %1348, %v1074_v37   ;;  %1101 = vperm.xlu0 %1349, %v1076_v8   ;;  %v995_v46 = vsel %vm373_vm1, %v993_v38, 0.0 }
 0x6d7   :  { %1098 = vperm.xlu1 %1348, %v1075_v41   ;;  %1107 = vperm.xlu0 %1349, %v1078_v44  }
 0x6db   :  { %1167 = vrot.lane.b32.xlu0 %v1165_v48, %s1423_s3  ;;  %1104 = vperm.xlu1 %1348, %v1077_v57  }
 0x6df   :  { %1110 = vperm.xlu1 %1348, %v1079_v20  }
 0x703   :  { %996 = vadd.xlane.f32.xlu1 %v995_v46 }
 0x74a   :  { %v1090_v49 = vpop.permute.xlu1 %1089  ;;  %v1093_v36 = vpop.permute.xlu0 %1092 }
 0x74b   :  { %v1115_v51 = vrot.slane %v1090_v49, %v1114_v24  ;;  %v1119_v10 = vrot.slane %v1093_v36, %v1114_v24 }
 0x74d   :  { %v1144_v15 = vsel %vm269_vm10, %v1119_v10, %v1115_v51  ;;  %vm1175_vm10 = vcmask 531456  }
 0x74e   :  { %v1096_v40 = vpop.permute.xlu1 %1095  ;;  %v1102_v13 = vpop.permute.xlu0 %1101 }
 0x74f   :  { %v1123_v53 = vrot.slane %v1096_v40, %v1114_v24  ;;  %v1131_v33 = vrot.slane %v1102_v13, %v1114_v24 }
 0x751   :  { %v1145_v22 = vsel %vm271_vm11, %v1123_v53, %v1144_v15  ;;  %vm1177_vm11 = vcmask 539648  }
 0x752   :  { %v1099_v1 = vpop.permute.xlu1 %1098  ;;  %v1108_v9 = vpop.permute.xlu0 %1107 }
 0x753   :  { %v1127_v18 = vrot.slane %v1099_v1, %v1114_v24  ;;  %v1139_v19 = vrot.slane %v1108_v9, %v1114_v24 }
 0x755   :  { %v1146_v26 = vsel %vm273_vm12, %v1127_v18, %v1145_v22 }
 0x756   :  { %v1105_v14 = vpop.permute.xlu1 %1104  ;;  %v1147_v2 = vsel %vm275_vm13, %v1131_v33, %v1146_v26  ;;  %v1168_v47 = vpop.permute.xlu0 %1167 }
 0x757   :  { %v1135_v12 = vrot.slane %v1105_v14, %v1114_v24  ;;  %v1170_v52 = vsel %vm584_vm4, %v1168_v47, 0.0 }
 0x759   :  { %v1148_v43 = vsel %vm277_vm14, %v1135_v12, %v1147_v2 }
 0x75a   :  { %v1111_v50 = vpop.permute.xlu1 %1110  ;;  %v1149_v23 = vsel %vm279_vm15, %v1139_v19, %v1148_v43 }
 0x75b   :  { %v1143_v29 = vrot.slane %v1111_v50, %v1114_v24 }
 0x75d   :  { %v1150_v32 = vsel %vm281_vm2, %v1143_v29, %v1149_v23 }
 0x75e   :  { %v1152_v30 = vsel %vm373_vm1, %v1150_v32, 0.0 }
 0x75f   :  { %1153 = vadd.xlane.f32.xlu0 %v1152_v30 }
 0x763   :  { %1171 = vadd.xlane.f32.xlu0 %v1170_v52 }
 0x78c   :  { %v997_v54 = vpop.xlane.xlu1 %996 }
 0x78d   :  { %v998_v11 = vadd.f32 1e-08, %v997_v54 }
 0x78f   :  { %1392 = vrcp.f32 %v998_v11 }
 0x79c   :  { %v1393_v58 = vpop.eup %1392 }
 0x7e8   :  { %v1154_v55 = vpop.xlane.xlu0 %1153 }
 0x7e9   :  { %v1155_v56 = vsub.f32 0.0, %v1154_v55 }
 0x7eb   :  { %v1156_v60 = vmul.f32 %v1393_v58, %v1155_v56 }
 0x7ec   :  { %v1172_v61 = vpop.xlane.xlu0 %1171 }
 0x7ed   :  { %v1174_v62 = vsel %vm435_vm3, %v1724_v59, %v1156_v60  ;;  %v1173_v63 = vmul.f32 -0.5, %v1172_v61 }
 0x7ef   :  { %v1176_v0 = vsel %vm1175_vm10, %v1174_v62, %v1173_v63 }
 0x7f0   :  { %v1178_v7 = vsel %vm1177_vm11, %v1176_v0, 0.0 }
 0x7f1   :  { %1179 = vst [vmem:[%s1809_s5] sm:$0xff] %v1178_v7 }
 0x7f2   :  { %1184 = vsyncpa [#allocation3], 1 }

</bundles_post_ra>
